<compile_context>
chip_gen: v6e
topology: v6e:2x2x1
jax: 0.10.0
libtpu: 0.0.40
codegen_flags: <defaults>
</compile_context>

<pallas_src>
import jax
import jax.numpy as jnp
import numpy as np
from jax.experimental import pallas as pl
from jax.experimental.pallas import tpu as pltpu

FEAT_DIM = 32
HALF = FEAT_DIM // 2            # residual / atom embedding width (feat_dim / 2)
CRG_DIM = 16                    # residue_crg_emb width
CAT_DIM = 2 * HALF + CRG_DIM    # final_linear input width (feat_dim + 16)
N_RES_TYPES = 21
N_ATOM_TYPES = 14
N_CRG_TYPES = 3
FUSED = N_RES_TYPES * N_CRG_TYPES      # 63 (aa, crg) combinations
FUSED_PAD = 64                         # aligned contraction dim for the MXU
OUT_W = N_ATOM_TYPES * FEAT_DIM        # 448 lane-dense output width
N_PLANES = 3                           # bf16 hi/lo/lo2 planes of the f32 table
TILE_MAX = 4096                        # residues per grid step (sublane rows)
VMEM_LIMIT_BYTES = 40 * 1024 * 1024    # fits v7x 64 MiB/TC; fine on v5e/v6e


def _round_up(x, m):
    return (x + m - 1) // m * m


def _choose_tile(nl):
    """Tile rows per grid step.

    <=1024 residues: single full-extent block (always a legal BlockSpec).
    Larger: aim for ~4 grid steps (so v7x megacore can shard the 'parallel'
    axis), rows 128-aligned (legal ragged blocks), capped at TILE_MAX so the
    double-buffered output + one f32 temp stay well under the VMEM limit.
    """
    if nl <= 1024:
        return nl
    return max(128, min(TILE_MAX, _round_up(-(-nl // 4), 128)))


def atom_encoder_kernel(idx_ref, tab_ref, out_ref):
    # idx_ref: (1, TILE)      int32  fused index aa*3 + crg (lane-dense)
    # tab_ref: (3, 64, 448)   bf16   fused table split into hi/lo/lo2 planes
    # out_ref: (TILE, 448)    f32    lane-dense output block
    tile = out_ref.shape[0]
    idx = idx_ref[...]                                              # (1, TILE)
    # Transposed one-hot (contraction dim on sublanes); 0/1 is exact in bf16.
    oh_t = (idx == jax.lax.broadcasted_iota(jnp.int32, (FUSED_PAD, tile), 0)
            ).astype(jnp.bfloat16)                                  # (64, TILE)
    dn = (((0,), (0,)), ((), ()))                                   # contract dim0 x dim0
    # Accumulate the three bf16 planes in f32 directly into out_ref so only
    # one (TILE, 448) f32 temporary is live at a time (keeps VMEM low at
    # TILE=4096 even with double-buffered outputs).
    out_ref[...] = jax.lax.dot_general(
        oh_t, tab_ref[0], dn, preferred_element_type=jnp.float32)
    out_ref[...] += jax.lax.dot_general(
        oh_t, tab_ref[1], dn, preferred_element_type=jnp.float32)
    out_ref[...] += jax.lax.dot_general(
        oh_t, tab_ref[2], dn, preferred_element_type=jnp.float32)


def _build_fused_table(params):
    """Fold embedding tables + final_linear into one (64, 448) f32 lookup table."""
    res_tab, atom_tab, crg_tab, w, b, _phys_w, _phys_b = params
    hi = jax.lax.Precision.HIGHEST
    w_res = w[0:HALF, :]                      # (16, 32)
    w_atom = w[HALF:2 * HALF, :]              # (16, 32)
    w_crg = w[2 * HALF:CAT_DIM, :]            # (16, 32)
    r_part = jnp.dot(res_tab, w_res, precision=hi)        # (21, 32)
    c_part = jnp.dot(crg_tab, w_crg, precision=hi)         # (3, 32)
    a_part = jnp.dot(atom_tab, w_atom, precision=hi) + b   # (14, 32) bias folded once
    rc = (r_part[:, None, :] + c_part[None, :, :]).reshape(FUSED, FEAT_DIM)
    full = (rc[:, None, :] + a_part[None, :, :]).reshape(FUSED, OUT_W)   # (63, 448)
    return jnp.pad(full, ((0, FUSED_PAD - FUSED), (0, 0)))               # (64, 448)


def _split_bf16_planes(tab_f32, n_planes=N_PLANES):
    """Split an f32 table into bf16 hi/lo/lo2 planes whose sum == tab (to ~2^-24)."""
    planes = []
    resid = tab_f32
    for _ in range(n_planes):
        p = resid.astype(jnp.bfloat16)
        planes.append(p)
        resid = resid - p.astype(jnp.float32)
    return jnp.stack(planes, axis=0)          # (3, 64, 448) bf16


def atom_encoder_forward(params, aa, pos14, atom_mask, phys, crg):
    """JAX wrapper reproducing AtomEncoderWithPhysChem.forward (use_chain_feat=False)."""
    N, L = aa.shape
    NL = N * L

    # Single fused, lane-dense index stream.
    idx = (aa.astype(jnp.int32) * N_CRG_TYPES + crg.astype(jnp.int32)).reshape(1, NL)

    tab_planes = _split_bf16_planes(_build_fused_table(params))     # (3, 64, 448) bf16

    tile = _choose_tile(NL)
    grid = pl.cdiv(NL, tile)   # ragged last block: OOB reads harmless, OOB writes dropped

    out = pl.pallas_call(
        atom_encoder_kernel,
        out_shape=jax.ShapeDtypeStruct((NL, OUT_W), jnp.float32),
        grid_spec=pltpu.PrefetchScalarGridSpec(
            num_scalar_prefetch=0,
            grid=(grid,),
            in_specs=[
                pl.BlockSpec((1, tile), lambda i: (0, i)),                        # fused idx
                pl.BlockSpec((N_PLANES, FUSED_PAD, OUT_W), lambda i: (0, 0, 0)),  # const table
            ],
            out_specs=pl.BlockSpec((tile, OUT_W), lambda i: (i, 0)),
        ),
        compiler_params=pltpu.CompilerParams(
            dimension_semantics=("parallel",),
            vmem_limit_bytes=VMEM_LIMIT_BYTES,
        ),
    )(idx, tab_planes)

    # (NL, 448) has the exact memory layout of (NL, 14, 32); glue reshapes are free.
    feats = out.reshape(N, L * N_ATOM_TYPES, FEAT_DIM)
    coors = pos14.reshape(N, L * N_ATOM_TYPES, 3)
    mask = atom_mask.reshape(N, L * N_ATOM_TYPES)
    return feats, coors, mask


def init_params(key):
    ks = jax.random.split(key, 7)
    res_tab = jax.random.normal(ks[0], (N_RES_TYPES, HALF), jnp.float32)
    atom_tab = jax.random.normal(ks[1], (N_ATOM_TYPES, HALF), jnp.float32)
    crg_tab = jax.random.normal(ks[2], (N_CRG_TYPES, CRG_DIM), jnp.float32)
    w = jax.random.normal(ks[3], (CAT_DIM, FEAT_DIM), jnp.float32) * 0.1   # final_linear W^T
    b = jax.random.normal(ks[4], (1, FEAT_DIM), jnp.float32) * 0.1
    # residue_phys_emb params: created for module fidelity, unused in non-chain output.
    phys_w = jax.random.normal(ks[5], (2, 16), jnp.float32) * 0.1
    phys_b = jax.random.normal(ks[6], (16,), jnp.float32) * 0.1
    return res_tab, atom_tab, crg_tab, w, b, phys_w, phys_b


def reference_feats(params, aa, crg):
    """Literal pure-JAX port of the PyTorch forward (feats output only)."""
    res_tab, atom_tab, crg_tab, w, b, _, _ = params
    N, L = aa.shape
    residual_idx = jnp.broadcast_to(aa[:, :, None], (N, L, 14)).reshape(N, -1)
    atom_idx = jnp.broadcast_to(jnp.arange(14, dtype=jnp.int32), (N, L, 14)).reshape(N, -1)
    crg_idx = jnp.broadcast_to(crg[:, :, None], (N, L, 14)).reshape(N, -1)
    feats = jnp.concatenate(
        [res_tab[residual_idx], atom_tab[atom_idx], crg_tab[crg_idx]], axis=-1)
    return jnp.dot(feats, w, precision=jax.lax.Precision.HIGHEST) + b[0]


def _run_case(fwd, params, key, N, L):
    k = jax.random.split(key, 5)
    aa = jax.random.randint(k[0], (N, L), 0, N_RES_TYPES, dtype=jnp.int32)
    crg = jax.random.randint(k[1], (N, L), 0, N_CRG_TYPES, dtype=jnp.int32)
    pos14 = jax.random.normal(k[2], (N, L, 14, 3), jnp.float32)
    atom_mask = (jax.random.uniform(k[3], (N, L, 14)) > 0.2).astype(jnp.float32)
    phys = jax.random.normal(k[4], (N, L, 2), jnp.float32)

    feats, coors, mask = fwd(params, aa, pos14, atom_mask, phys, crg)
    jax.block_until_ready(feats)

    assert feats.shape == (N, L * 14, FEAT_DIM)
    assert coors.shape == (N, L * 14, 3)
    assert mask.shape == (N, L * 14)

    ref = reference_feats(params, aa, crg)
    np.testing.assert_allclose(np.asarray(feats), np.asarray(ref), rtol=1e-5, atol=1e-5)


if __name__ == "__main__":
    key = jax.random.PRNGKey(0)
    k_params, k_small, k_ragged = jax.random.split(key, 3)
    params = init_params(k_params)

    fwd = jax.jit(atom_encoder_forward)

    # Small module-consistent shape: N=2, L=8 (single full-extent block path).
    _run_case(fwd, params, k_small, N=2, L=8)

    # Larger shape exercising the multi-step ragged grid path (NL=1250, tile=384).
    _run_case(fwd, params, k_ragged, N=5, L=250)

    print("KERNEL_OK")
</pallas_src>

<mosaic_0001>
module attributes {stable_mosaic.version = 11 : i64} {
  func.func @atom_encoder_kernel(%arg0: i32, %arg1: memref<1x16xi32, #tpu.memory_space<vmem>>, %arg2: memref<3x64x448xbf16, #tpu.memory_space<vmem>>, %arg3: memref<16x448xf32, #tpu.memory_space<vmem>>) attributes {dimension_semantics = [#tpu.dimension_semantics<parallel>], iteration_bounds = array<i64: 1>, scalar_prefetch = 0 : i64, scratch_operands = 0 : i64, tpu.core_type = #tpu.core_type<tc>, window_params = [{transform_indices = @transform_0, window_bounds = array<i64: 1, 16>}, {pipeline_mode = #tpu.pipeline_mode<synchronous>, transform_indices = @transform_1, window_bounds = array<i64: 3, 64, 448>}, {transform_indices = @transform_2, window_bounds = array<i64: 16, 448>}]} {
    %c0 = arith.constant 0 : index
    %c0_0 = arith.constant 0 : index
    %0 = vector.load %arg1[%c0, %c0_0] : memref<1x16xi32, #tpu.memory_space<vmem>>, vector<1x16xi32>
    %1 = tpu.iota {dimensions = array<i32: 0>} : vector<64x16xi32>
    %2 = vector.broadcast %0 : vector<1x16xi32> to vector<64x16xi32>
    %3 = arith.cmpi eq, %2, %1 : vector<64x16xi32>
    %4 = arith.extui %3 : vector<64x16xi1> to vector<64x16xi32>
    %5 = arith.sitofp %4 : vector<64x16xi32> to vector<64x16xf32>
    %6 = arith.truncf %5 : vector<64x16xf32> to vector<64x16xbf16>
    %c0_1 = arith.constant 0 : index
    %c0_2 = arith.constant 0 : index
    %c0_3 = arith.constant 0 : index
    %7 = vector.load %arg2[%c0_1, %c0_2, %c0_3] : memref<3x64x448xbf16, #tpu.memory_space<vmem>>, vector<1x64x448xbf16>
    %8 = vector.shape_cast %7 : vector<1x64x448xbf16> to vector<64x448xbf16>
    %cst = arith.constant dense<0.000000e+00> : vector<16x448xf32>
    %9 = tpu.matmul %6, %8, %cst {dimension_numbers = #tpu.dot_dimension_numbers<[0], [0], [1], [1], [0, 1, 1, 1], [], []>} : vector<64x16xbf16>, vector<64x448xbf16>, vector<16x448xf32> -> vector<16x448xf32>
    %c0_4 = arith.constant 0 : index
    %c0_5 = arith.constant 0 : index
    %10 = vector.load %arg3[%c0_4, %c0_5] : memref<16x448xf32, #tpu.memory_space<vmem>>, vector<16x448xf32>
    tpu.vector_store %arg3[%c0_4, %c0_5], %9 {strides = array<i32>} : memref<16x448xf32, #tpu.memory_space<vmem>>, vector<16x448xf32>,
    %c0_6 = arith.constant 0 : index
    %c0_7 = arith.constant 0 : index
    %11 = vector.load %arg3[%c0_6, %c0_7] : memref<16x448xf32, #tpu.memory_space<vmem>>, vector<16x448xf32>
    %c1 = arith.constant 1 : index
    %c0_8 = arith.constant 0 : index
    %c0_9 = arith.constant 0 : index
    %12 = vector.load %arg2[%c1, %c0_8, %c0_9] : memref<3x64x448xbf16, #tpu.memory_space<vmem>>, vector<1x64x448xbf16>
    %13 = vector.shape_cast %12 : vector<1x64x448xbf16> to vector<64x448xbf16>
    %cst_10 = arith.constant dense<0.000000e+00> : vector<16x448xf32>
    %14 = tpu.matmul %6, %13, %cst_10 {dimension_numbers = #tpu.dot_dimension_numbers<[0], [0], [1], [1], [0, 1, 1, 1], [], []>} : vector<64x16xbf16>, vector<64x448xbf16>, vector<16x448xf32> -> vector<16x448xf32>
    %15 = arith.addf %11, %14 : vector<16x448xf32>
    %c0_11 = arith.constant 0 : index
    %c0_12 = arith.constant 0 : index
    %16 = vector.load %arg3[%c0_11, %c0_12] : memref<16x448xf32, #tpu.memory_space<vmem>>, vector<16x448xf32>
    tpu.vector_store %arg3[%c0_11, %c0_12], %15 {strides = array<i32>} : memref<16x448xf32, #tpu.memory_space<vmem>>, vector<16x448xf32>,
    %c0_13 = arith.constant 0 : index
    %c0_14 = arith.constant 0 : index
    %17 = vector.load %arg3[%c0_13, %c0_14] : memref<16x448xf32, #tpu.memory_space<vmem>>, vector<16x448xf32>
    %c2 = arith.constant 2 : index
    %c0_15 = arith.constant 0 : index
    %c0_16 = arith.constant 0 : index
    %18 = vector.load %arg2[%c2, %c0_15, %c0_16] : memref<3x64x448xbf16, #tpu.memory_space<vmem>>, vector<1x64x448xbf16>
    %19 = vector.shape_cast %18 : vector<1x64x448xbf16> to vector<64x448xbf16>
    %cst_17 = arith.constant dense<0.000000e+00> : vector<16x448xf32>
    %20 = tpu.matmul %6, %19, %cst_17 {dimension_numbers = #tpu.dot_dimension_numbers<[0], [0], [1], [1], [0, 1, 1, 1], [], []>} : vector<64x16xbf16>, vector<64x448xbf16>, vector<16x448xf32> -> vector<16x448xf32>
    %21 = arith.addf %17, %20 : vector<16x448xf32>
    %c0_18 = arith.constant 0 : index
    %c0_19 = arith.constant 0 : index
    %22 = vector.load %arg3[%c0_18, %c0_19] : memref<16x448xf32, #tpu.memory_space<vmem>>, vector<16x448xf32>
    tpu.vector_store %arg3[%c0_18, %c0_19], %21 {strides = array<i32>} : memref<16x448xf32, #tpu.memory_space<vmem>>, vector<16x448xf32>,
    return
  }
  func.func @transform_0(%arg0: i32) -> (i32, i32) {
    %c0_i32 = arith.constant 0 : i32
    %c0_i32_0 = arith.constant 0 : i32
    return %c0_i32, %arg0 : i32, i32
  }
  func.func @transform_1(%arg0: i32) -> (i32, i32, i32) {
    %c0_i32 = arith.constant 0 : i32
    %c0_i32_0 = arith.constant 0 : i32
    %c0_i32_1 = arith.constant 0 : i32
    %c0_i32_2 = arith.constant 0 : i32
    return %c0_i32, %c0_i32_0, %c0_i32_1 : i32, i32, i32
  }
  func.func @transform_2(%arg0: i32) -> (i32, i32) {
    %c0_i32 = arith.constant 0 : i32
    %c0_i32_0 = arith.constant 0 : i32
    return %arg0, %c0_i32 : i32, i32
  }
}

</mosaic_0001>

<bundles_post_ra>
// kernel: atom_encoder_forward.1
= control target key start
LH: loop header
LB: loop body
LE: loop exit
PB: predicated region body
PF: predicated region fallthrough
CT: control target
= control target key end

     0   :  { %v13_v0 = vlaneseq  ;;  %v851_v2 = vmov 0   ;;  %v852_v11 = vmov 0.0   ;;  %vm166_vm8 = vcmask 523264   ;;  %s1089_s0 = inlined_call_operand.vmem [shape: s32[1,16], index: 0, kind: input, shape index: {}]   ;;  %s1090_s1 = inlined_call_operand.vmem [shape: bf16[3,64,448], index: 1, kind: input, shape index: {}]   ;;  %s1091_s2 = inlined_call_operand.vmem [shape: f32[16,448], index: 2, kind: output, shape index: {}]  }
   0x1   :  { %v682_v1 = vld [vmem:[%s1089_s0] ss:$0 sm:$0xff]  ;;  %202 = vmatprep.mubr.bf16.mxu0 %v851_v2  ;;  %245 = vmatprep.mubr.bf16.mxu1 %v851_v2  ;;  %v779_v4 = vld [vmem:[%s1090_s1 + $0x64] ss:$16 sps:$4 sm:$0xff]   ;;  %v781_v5 = vld [vmem:[%s1090_s1 + $0x6c] ss:$16 sps:$4 sm:$0xff]  }
   0x2   :  { %v14_v3 = vshrl.u32 %v13_v0, 7  ;;  %v783_v6 = vld [vmem:[%s1090_s1 + $0x60] ss:$16 sps:$4 sm:$0xff]   ;;  %v784_v7 = vld [vmem:[%s1090_s1 + $0x68] ss:$16 sps:$4 sm:$0xff]   ;;  %178 = vmatprep.subr.bf16.mxu0 %v779_v4  ;;  %221 = vmatprep.subr.bf16.mxu1 %v781_v5 }
   0x3   :  { %179 = vmatpush1.bf16.msra.mxu0 %v783_v6  ;;  %v785_v15 = vld [vmem:[%s1090_s1 + $0x44] ss:$16 sps:$4 sm:$0xff]   ;;  %222 = vmatpush1.bf16.msra.mxu1 %v784_v7  ;;  %v787_v17 = vld [vmem:[%s1090_s1 + $0x4c] ss:$16 sps:$4 sm:$0xff]   ;;  %v789_v18 = vld [vmem:[%s1090_s1 + $0x40] ss:$16 sps:$4 sm:$0xff]  }
   0x4   :  { %v15_v8 = vadd.s32 8, %v14_v3  ;;  %vm26_vm0 = vcmp.eq.s32.totalorder %v682_v1, %v14_v3  ;;  %v16_v9 = vadd.s32 16, %v14_v3  ;;  %v17_v10 = vadd.s32 24, %v14_v3  ;;  %180 = vmatprep.subr.bf16.mxu0 %v785_v15  ;;  %v790_v22 = vld [vmem:[%s1090_s1 + $0x48] ss:$16 sps:$4 sm:$0xff]   ;;  %223 = vmatprep.subr.bf16.mxu1 %v787_v17 }
   0x5   :  { %v683_v12 = vsel %vm26_vm0, 1.0, %v852_v11  ;;  %v18_v13 = vadd.s32 32, %v14_v3  ;;  %v19_v14 = vadd.s32 40, %v14_v3  ;;  %v20_v16 = vadd.s32 48, %v14_v3  ;;  %v791_v25 = vld [vmem:[%s1090_s1 + $0x24] ss:$16 sps:$4 sm:$0xff]  }
   0x6   :  { %vm27_vm1 = vcmp.eq.s32.totalorder %v682_v1, %v15_v8  ;;  %vm28_vm2 = vcmp.eq.s32.totalorder %v682_v1, %v16_v9  ;;  %vm29_vm3 = vcmp.eq.s32.totalorder %v682_v1, %v17_v10  ;;  %v21_v24 = vadd.s32 56, %v14_v3  ;;  %v793_v26 = vld [vmem:[%s1090_s1 + $0x2c] ss:$16 sps:$4 sm:$0xff]   ;;  %v795_v27 = vld [vmem:[%s1090_s1 + $0x20] ss:$16 sps:$4 sm:$0xff]  }
   0x7   :  { %v684_v19 = vsel %vm27_vm1, 1.0, %v852_v11  ;;  %v685_v20 = vsel %vm28_vm2, 1.0, %v852_v11  ;;  %v686_v21 = vsel %vm29_vm3, 1.0, %v852_v11  ;;  %vm30_vm4 = vcmp.eq.s32.totalorder %v682_v1, %v18_v13  ;;  %181 = vmatpush1.bf16.msra.mxu0 %v789_v18  ;;  %224 = vmatpush1.bf16.msra.mxu1 %v790_v22  ;;  %v796_v29 = vld [vmem:[%s1090_s1 + $0x28] ss:$16 sps:$4 sm:$0xff]  }
   0x8   :  { %v50_v23 = vpack.c.bf16 %v684_v19, %v683_v12  ;;  %vm31_vm5 = vcmp.eq.s32.totalorder %v682_v1, %v19_v14  ;;  %v51_v28 = vpack.c.bf16 %v686_v21, %v685_v20  ;;  %v687_v30 = vsel %vm30_vm4, 1.0, %v852_v11  ;;  %182 = vmatprep.subr.bf16.mxu0 %v791_v25  ;;  %225 = vmatprep.subr.bf16.mxu1 %v793_v26  ;;  %v797_v32 = vld [vmem:[%s1090_s1 + $0x4] ss:$16 sps:$4 sm:$0xff]   ;;  %v799_v33 = vld [vmem:[%s1090_s1 + $0xc] ss:$16 sps:$4 sm:$0xff]  }
   0x9   :  { %v688_v31 = vsel %vm31_vm5, 1.0, %v852_v11  ;;  %vm32_vm6 = vcmp.eq.s32.totalorder %v682_v1, %v20_v16  ;;  %vm33_vm7 = vcmp.eq.s32.totalorder %v682_v1, %v21_v24  ;;  %v801_v34 = vld [vmem:[%s1090_s1] ss:$16 sps:$4 sm:$0xff]   ;;  %v802_v37 = vld [vmem:[%s1090_s1 + $0x8] ss:$16 sps:$4 sm:$0xff]  }
   0xa   :  { %70 = vxpose.xlu0.c.b16.start [1/4] (short) (narrow) %v50_v23, 16  ;;  %v52_v35 = vpack.c.bf16 %v688_v31, %v687_v30  ;;  %v689_v36 = vsel %vm32_vm6, 1.0, %v852_v11  ;;  %v690_v38 = vsel %vm33_vm7, 1.0, %v852_v11  ;;  %v805_v39 = vld [vmem:[%s1090_s1 + $0xe4] ss:$16 sps:$4 sm:$0xff]  }
   0xb   :  { %183 = vmatpush1.bf16.msra.mxu0 %v795_v27  ;;  %226 = vmatpush1.bf16.msra.mxu1 %v796_v29  ;;  %v808_v40 = vld [vmem:[%s1090_s1 + $0xec] ss:$16 sps:$4 sm:$0xff]   ;;  %v53_v41 = vpack.c.bf16 %v690_v38, %v689_v36  ;;  %v803_v42 = vld [vmem:[%s1090_s1 + $0xe0] ss:$16 sps:$4 sm:$0xff]   ;;  %v806_v43 = vld [vmem:[%s1090_s1 + $0xe8] ss:$16 sps:$4 sm:$0xff]  }
   0xc   :  { %184 = vmatprep.subr.bf16.mxu0 %v797_v32  ;;  %227 = vmatprep.subr.bf16.mxu1 %v799_v33  ;;  %v811_v44 = vld [vmem:[%s1090_s1 + $0xc4] ss:$16 sps:$4 sm:$0xff]   ;;  %v814_v45 = vld [vmem:[%s1090_s1 + $0xcc] ss:$16 sps:$4 sm:$0xff]   ;;  %v809_v47 = vld [vmem:[%s1090_s1 + $0xc0] ss:$16 sps:$4 sm:$0xff]  }
   0xd   :  { %v812_v48 = vld [vmem:[%s1090_s1 + $0xc8] ss:$16 sps:$4 sm:$0xff]   ;;  %v817_v49 = vld [vmem:[%s1090_s1 + $0xa4] ss:$16 sps:$4 sm:$0xff]   ;;  %v820_v50 = vld [vmem:[%s1090_s1 + $0xac] ss:$16 sps:$4 sm:$0xff]  }
   0xe   :  { %71 = vxpose.xlu0.c.b16.cont [2/4] (short) (narrow) %v51_v28, 16  ;;  %v815_v51 = vld [vmem:[%s1090_s1 + $0xa0] ss:$16 sps:$4 sm:$0xff]   ;;  %v818_v52 = vld [vmem:[%s1090_s1 + $0xa8] ss:$16 sps:$4 sm:$0xff]  }
   0xf   :  { %185 = vmatpush1.bf16.msra.mxu0 %v801_v34  ;;  %228 = vmatpush1.bf16.msra.mxu1 %v802_v37  ;;  %v823_v53 = vld [vmem:[%s1090_s1 + $0x84] ss:$16 sps:$4 sm:$0xff]   ;;  %v826_v54 = vld [vmem:[%s1090_s1 + $0x8c] ss:$16 sps:$4 sm:$0xff]   ;;  %v821_v55 = vld [vmem:[%s1090_s1 + $0x80] ss:$16 sps:$4 sm:$0xff]  }
  0x10   :  { %377 = vmatprep.subr.bf16.mxu0 %v805_v39  ;;  %420 = vmatprep.subr.bf16.mxu1 %v808_v40  ;;  %v824_v56 = vld [vmem:[%s1090_s1 + $0x88] ss:$16 sps:$4 sm:$0xff]   ;;  %v829_v57 = vld [vmem:[%s1090_s1 + $0x164] ss:$16 sps:$4 sm:$0xff]   ;;  %v832_v58 = vld [vmem:[%s1090_s1 + $0x16c] ss:$16 sps:$4 sm:$0xff]  }
  0x11   :  { %v827_v59 = vld [vmem:[%s1090_s1 + $0x160] ss:$16 sps:$4 sm:$0xff]   ;;  %v830_v60 = vld [vmem:[%s1090_s1 + $0x168] ss:$16 sps:$4 sm:$0xff]   ;;  %v835_v61 = vld [vmem:[%s1090_s1 + $0x144] ss:$16 sps:$4 sm:$0xff]  }
  0x12   :  { %72 = vxpose.xlu0.c.b16.cont [3/4] (short) (narrow) %v52_v35, 16  ;;  %v838_v62 = vld [vmem:[%s1090_s1 + $0x14c] ss:$16 sps:$4 sm:$0xff]   ;;  %v833_v63 = vld [vmem:[%s1090_s1 + $0x140] ss:$16 sps:$4 sm:$0xff]  }
  0x13   :  { %v836_v0 = vld [vmem:[%s1090_s1 + $0x148] ss:$16 sps:$4 sm:$0xff]   ;;  %v841_v1 = vld [vmem:[%s1090_s1 + $0x124] ss:$16 sps:$4 sm:$0xff]   ;;  %v844_v3 = vld [vmem:[%s1090_s1 + $0x12c] ss:$16 sps:$4 sm:$0xff]  }
  0x14   :  { %v839_v4 = vld [vmem:[%s1090_s1 + $0x120] ss:$16 sps:$4 sm:$0xff]   ;;  %v842_v5 = vld [vmem:[%s1090_s1 + $0x128] ss:$16 sps:$4 sm:$0xff]   ;;  %v847_v6 = vld [vmem:[%s1090_s1 + $0x104] ss:$16 sps:$4 sm:$0xff]  }
  0x15   :  { %v845_v7 = vld [vmem:[%s1090_s1 + $0x100] ss:$16 sps:$4 sm:$0xff]   ;;  %v848_v8 = vld [vmem:[%s1090_s1 + $0x108] ss:$16 sps:$4 sm:$0xff]  }
  0x16   :  { %73 = vxpose.xlu0.c.b16.end [4/4] (short) (narrow) %v53_v41, 16 }
  0x6c   :  { %v939_v46 = vpop.trf.xlu0 }
  0x6d   :  { %707 = vmatmul.mubr.msk.bf16.vlgmr.msra.gmra.mxu0 %vm166_vm8, %v939_v46  ;;  %708 = vmatmul.mubr.msk.bf16.vlgmr.msra.gmra.mxu1 %vm166_vm8, %v939_v46 }
  0x6e   :  { %378 = vmatpush1.bf16.msra.mxu0 %v803_v42  ;;  %421 = vmatpush1.bf16.msra.mxu1 %v806_v43 }
  0x6f   :  { %379 = vmatprep.subr.bf16.mxu0 %v811_v44  ;;  %422 = vmatprep.subr.bf16.mxu1 %v814_v45 }
  0x70   :  { %401 = vmatprep.mubr.bf16.mxu0 %v851_v2  ;;  %444 = vmatprep.mubr.bf16.mxu1 %v851_v2 }
  0x72   :  { %380 = vmatpush1.bf16.msra.mxu0 %v809_v47  ;;  %423 = vmatpush1.bf16.msra.mxu1 %v812_v48 }
  0x73   :  { %381 = vmatprep.subr.bf16.mxu0 %v817_v49  ;;  %424 = vmatprep.subr.bf16.mxu1 %v820_v50 }
  0x76   :  { %382 = vmatpush1.bf16.msra.mxu0 %v815_v51  ;;  %425 = vmatpush1.bf16.msra.mxu1 %v818_v52 }
  0x77   :  { %383 = vmatprep.subr.bf16.mxu0 %v823_v53  ;;  %426 = vmatprep.subr.bf16.mxu1 %v826_v54 }
  0x7a   :  { %384 = vmatpush1.bf16.msra.mxu0 %v821_v55  ;;  %427 = vmatpush1.bf16.msra.mxu1 %v824_v56 }
  0x7b   :  { %584 = vmatprep.subr.bf16.mxu0 %v829_v57  ;;  %627 = vmatprep.subr.bf16.mxu1 %v832_v58 }
  0x7d   :  { %741 = vmatmul.mubr.msk.bf16.vlgmr.msra.gmra.mxu0 %vm166_vm8, %v939_v46  ;;  %742 = vmatmul.mubr.msk.bf16.vlgmr.msra.gmra.mxu1 %vm166_vm8, %v939_v46 }
  0x7e   :  { %585 = vmatpush1.bf16.msra.mxu0 %v827_v59  ;;  %628 = vmatpush1.bf16.msra.mxu1 %v830_v60 }
  0x7f   :  { %586 = vmatprep.subr.bf16.mxu0 %v835_v61  ;;  %629 = vmatprep.subr.bf16.mxu1 %v838_v62 }
  0x80   :  { %608 = vmatprep.mubr.bf16.mxu0 %v851_v2  ;;  %651 = vmatprep.mubr.bf16.mxu1 %v851_v2  ;;  %v850_v2 = vld [vmem:[%s1090_s1 + $0x10c] ss:$16 sps:$4 sm:$0xff]  }
  0x82   :  { %587 = vmatpush1.bf16.msra.mxu0 %v833_v63  ;;  %630 = vmatpush1.bf16.msra.mxu1 %v836_v0 }
  0x83   :  { %588 = vmatprep.subr.bf16.mxu0 %v841_v1  ;;  %631 = vmatprep.subr.bf16.mxu1 %v844_v3 }
  0x86   :  { %589 = vmatpush1.bf16.msra.mxu0 %v839_v4  ;;  %632 = vmatpush1.bf16.msra.mxu1 %v842_v5 }
  0x87   :  { %590 = vmatprep.subr.bf16.mxu0 %v847_v6  ;;  %633 = vmatprep.subr.bf16.mxu1 %v850_v2 }
  0x8a   :  { %591 = vmatpush1.bf16.msra.mxu0 %v845_v7  ;;  %634 = vmatpush1.bf16.msra.mxu1 %v848_v8 }
  0x8d   :  { %775 = vmatmul.mubr.msk.bf16.vlgmr.msra.gmra.mxu0 %vm166_vm8, %v939_v46  ;;  %776 = vmatmul.mubr.msk.bf16.vlgmr.msra.gmra.mxu1 %vm166_vm8, %v939_v46 }
 0x12d   :  { %v247_v9 = vpop.f32.mrf.mxu1  ;;  %v204_v11 = vpop.f32.mrf.mxu0 }
 0x12f   :  { %v249_v10 = vpop.f32.mrf.mxu1  ;;  %v206_v14 = vpop.f32.mrf.mxu0 }
 0x130   :  { %259 = vst.msk [vmem:[%s1091_s2 + $0x18] sm:$0xff] %vm166_vm8, %v249_v10 }
 0x131   :  { %v251_v12 = vpop.f32.mrf.mxu1  ;;  %v208_v15 = vpop.f32.mrf.mxu0 }
 0x133   :  { %v253_v13 = vpop.f32.mrf.mxu1  ;;  %v210_v16 = vpop.f32.mrf.mxu0 }
 0x134   :  { %263 = vst.msk [vmem:[%s1091_s2 + $0x38] sm:$0xff] %vm166_vm8, %v253_v13 }
 0x137   :  { %v267_v19 = vld [vmem:[%s1091_s2 + $0x18] sm:$0xff] }
 0x13b   :  { %v271_v24 = vld [vmem:[%s1091_s2 + $0x38] sm:$0xff] }
 0x13d   :  { %v446_v17 = vpop.f32.mrf.mxu1  ;;  %v403_v18 = vpop.f32.mrf.mxu0 }
 0x13e   :  { %v455_v29 = vadd.f32 %v403_v18, %v204_v11  ;;  %v457_v30 = vadd.f32 %v446_v17, %v247_v9 }
 0x13f   :  { %v448_v20 = vpop.f32.mrf.mxu1  ;;  %v405_v23 = vpop.f32.mrf.mxu0 }
 0x140   :  { %v458_v21 = vadd.f32 %v448_v20, %v267_v19  ;;  %v456_v33 = vadd.f32 %v405_v23, %v206_v14 }
 0x141   :  { %v450_v22 = vpop.f32.mrf.mxu1  ;;  %v407_v27 = vpop.f32.mrf.mxu0 }
 0x142   :  { %466 = vst.msk [vmem:[%s1091_s2 + $0x18] sm:$0xff] %vm166_vm8, %v458_v21  ;;  %v459_v39 = vadd.f32 %v407_v27, %v208_v15  ;;  %v461_v40 = vadd.f32 %v450_v22, %v251_v12 }
 0x143   :  { %v452_v25 = vpop.f32.mrf.mxu1  ;;  %v409_v28 = vpop.f32.mrf.mxu0 }
 0x144   :  { %v462_v26 = vadd.f32 %v452_v25, %v271_v24  ;;  %v460_v45 = vadd.f32 %v409_v28, %v210_v16 }
 0x146   :  { %470 = vst.msk [vmem:[%s1091_s2 + $0x38] sm:$0xff] %vm166_vm8, %v462_v26 }
 0x149   :  { %v474_v37 = vld [vmem:[%s1091_s2 + $0x18] sm:$0xff] }
 0x14d   :  { %v610_v31 = vpop.f32.mrf.mxu0  ;;  %v653_v32 = vpop.f32.mrf.mxu1  ;;  %v478_v49 = vld [vmem:[%s1091_s2 + $0x38] sm:$0xff] }
 0x14e   :  { %v662_v34 = vadd.f32 %v610_v31, %v455_v29  ;;  %v664_v35 = vadd.f32 %v653_v32, %v457_v30 }
 0x14f   :  { %v612_v36 = vpop.f32.mrf.mxu0  ;;  %v655_v38 = vpop.f32.mrf.mxu1 }
 0x150   :  { %670 = vst [vmem:[%s1091_s2] sm:$0xff] %v662_v34  ;;  %672 = vst [vmem:[%s1091_s2 + $0x10] sm:$0xff] %v664_v35  ;;  %v663_v41 = vadd.f32 %v612_v36, %v456_v33  ;;  %v665_v42 = vadd.f32 %v655_v38, %v474_v37 }
 0x151   :  { %v614_v43 = vpop.f32.mrf.mxu0  ;;  %v657_v44 = vpop.f32.mrf.mxu1 }
 0x152   :  { %671 = vst [vmem:[%s1091_s2 + $0x8] sm:$0xff] %v663_v41  ;;  %673 = vst.msk [vmem:[%s1091_s2 + $0x18] sm:$0xff] %vm166_vm8, %v665_v42  ;;  %v666_v46 = vadd.f32 %v614_v43, %v459_v39  ;;  %v668_v47 = vadd.f32 %v657_v44, %v461_v40 }
 0x153   :  { %v616_v48 = vpop.f32.mrf.mxu0  ;;  %v659_v50 = vpop.f32.mrf.mxu1 }
 0x154   :  { %674 = vst [vmem:[%s1091_s2 + $0x20] sm:$0xff] %v666_v46  ;;  %676 = vst [vmem:[%s1091_s2 + $0x30] sm:$0xff] %v668_v47  ;;  %v667_v51 = vadd.f32 %v616_v48, %v460_v45  ;;  %v669_v52 = vadd.f32 %v659_v50, %v478_v49 }
 0x156   :  { %675 = vst [vmem:[%s1091_s2 + $0x28] sm:$0xff] %v667_v51  ;;  %677 = vst.msk [vmem:[%s1091_s2 + $0x38] sm:$0xff] %vm166_vm8, %v669_v52 }

</bundles_post_ra>
